<compile_context>
chip_gen: v6e
topology: v6e:2x2x1
jax: 0.10.0
libtpu: 0.0.40
codegen_flags: <defaults>
</compile_context>

<pallas_src>
import jax
import jax.numpy as jnp
from jax.experimental import pallas as pl
from jax.experimental.pallas import tpu as pltpu


# Column layout of the packed parameter array.
_AMP, _CEN, _SIG, _SLOPE, _CONST = 0, 1, 2, 3, 4
_NPARAM = 5


def _raman_kernel(x_ref, p_ref, o_ref):
    # x block: (TR, L) in the I/O dtype; compute in f32.
    x = x_ref[...].astype(jnp.float32)

    # Per-row parameter columns (TR, 1), already float32; broadcast below.
    amp = p_ref[:, _AMP:_AMP + 1]
    cen = p_ref[:, _CEN:_CEN + 1]
    sig = p_ref[:, _SIG:_SIG + 1]
    slope = p_ref[:, _SLOPE:_SLOPE + 1]
    const = p_ref[:, _CONST:_CONST + 1]

    # amp / (((x-cen)/sig)^2 + 1)  ==  amp*sig^2 / ((x-cen)^2 + sig^2)
    # -> a single per-element divide; the per-row numerator is (TR,1) work.
    sig2 = sig * sig
    num = amp * sig2                       # (TR, 1)
    diff = x - cen
    denom = diff * diff + sig2             # (TR, L)

    o_ref[...] = (const + slope * x + num / denom).astype(o_ref.dtype)


def raman_one_peak_forward(x, amplitudes, centers, sigmas, slopes, constants,
                           *, vmem_budget_bytes=24 * 1024 * 1024,
                           vmem_limit_bytes=32 * 1024 * 1024,
                           min_grid_steps=8):
    """x: (H, W, L); each param: (H, W, 1). Returns (H, W, L)."""
    H, W, L = x.shape
    R = H * W
    dtype = x.dtype
    itemsize = jnp.dtype(dtype).itemsize

    x2 = x.reshape(R, L)

    # Pack the five per-pixel parameters into one (R, 5) float32 array so each
    # grid step issues a single small params DMA. Kept float32 even for bf16 x
    # so centers/sigmas don't lose precision.
    params = jnp.concatenate(
        [p.reshape(R, 1).astype(jnp.float32)
         for p in (amplitudes, centers, sigmas, slopes, constants)],
        axis=1)                                                  # (R, 5)

    # --- Row-tile sizing from a total VMEM budget -----------------------------
    # Per row of tile:
    #   x   : 2 pipeline buffers * L * itemsize
    #   out : 2 pipeline buffers * L * itemsize
    #   prm : 2 pipeline buffers * 128 lanes (VMEM lane-padding of the 5 real
    #         columns) * 4 B
    #   tmp : allowance of ~4 live f32 block-sized intermediates inside the body
    bytes_per_row = (4 * L * itemsize) + (2 * 128 * 4) + (4 * L * 4)
    tr = max(8, vmem_budget_bytes // bytes_per_row)
    tr = min(tr, R)

    # Keep >= min_grid_steps grid iterations when there is enough work: the
    # "parallel" axis is sharded across v7x's two TensorCores and the DMA
    # pipeline needs multiple steps to overlap copy with compute.
    if R >= min_grid_steps * 8:
        tr = min(tr, max(8, ((R // min_grid_steps) // 8) * 8))

    if tr < R:
        tr = max(8, (tr // 8) * 8)   # sublane-aligned; ragged last tile is OK
    else:
        tr = R                       # single full-dim block: always legal

    grid = (pl.cdiv(R, tr),)

    # Last block dim equals the full array dim (L / 5), so no 128-divisibility
    # requirement; no wrapper-side padding needed.
    x_spec = pl.BlockSpec((tr, L), lambda i: (i, 0))
    p_spec = pl.BlockSpec((tr, _NPARAM), lambda i: (i, 0))

    out = pl.pallas_call(
        _raman_kernel,
        out_shape=jax.ShapeDtypeStruct((R, L), dtype),
        grid_spec=pltpu.PrefetchScalarGridSpec(
            num_scalar_prefetch=0,
            grid=grid,
            in_specs=[x_spec, p_spec],
            out_specs=x_spec,
        ),
        compiler_params=pltpu.CompilerParams(
            dimension_semantics=("parallel",),
            vmem_limit_bytes=vmem_limit_bytes),
    )(x2, params)

    return out.reshape(H, W, L)


def _reference(x, amplitudes, centers, sigmas, slopes, constants):
    # Pure-JAX reference following the original PyTorch formula exactly.
    t = (x - centers) / sigmas
    return constants + slopes * x + amplitudes * (1.0 / (t * t + 1.0))


if __name__ == "__main__":
    dtype = jnp.float32
    key = jax.random.PRNGKey(0)

    # Deterministic parameter "guesses" (as in __init__: guess * ones((H, W, 1))).
    peak_0_amplitude_guess = 1.5
    peak_0_center_guess = 0.3
    peak_0_sigma_guess = 0.7
    slope_guess = 0.1
    constant_guess = 0.05

    def run_case(H, W, L, k):
        amplitudes = jnp.full((H, W, 1), peak_0_amplitude_guess, dtype=dtype)
        centers = jnp.full((H, W, 1), peak_0_center_guess, dtype=dtype)
        sigmas = jnp.full((H, W, 1), peak_0_sigma_guess, dtype=dtype)
        slopes = jnp.full((H, W, 1), slope_guess, dtype=dtype)
        constants = jnp.full((H, W, 1), constant_guess, dtype=dtype)

        x = jax.random.uniform(k, (H, W, L), dtype=dtype, minval=-2.0, maxval=2.0)

        out = raman_one_peak_forward(x, amplitudes, centers, sigmas,
                                     slopes, constants)
        out = jax.block_until_ready(out)

        ref = _reference(x, amplitudes, centers, sigmas, slopes, constants)
        assert out.shape == (H, W, L)
        # rtol slightly relaxed vs 1e-6 because the in-kernel Lorentzian is
        # algebraically reassociated (identical math, few-ulp rounding diff).
        assert jnp.allclose(out, ref, atol=1e-6, rtol=1e-5), (
            f"mismatch for shape {(H, W, L)}")

    k1, k2, k3 = jax.random.split(key, 3)
    # Aligned shape: R=128 rows -> 8-step grid, lane-dense 128-wide L.
    run_case(8, 16, 128, k1)
    # Ragged L, small R -> single full-dim block, masked partial-lane stores.
    run_case(5, 7, 100, k2)
    # Ragged L and ragged row count -> multi-step grid with partial last tile.
    run_case(9, 13, 100, k3)

    print("KERNEL_OK")
</pallas_src>

<mosaic_0001>
module attributes {stable_mosaic.version = 11 : i64} {
  func.func @_raman_kernel(%arg0: i32, %arg1: memref<16x128xf32, #tpu.memory_space<vmem>>, %arg2: memref<16x5xf32, #tpu.memory_space<vmem>>, %arg3: memref<16x128xf32, #tpu.memory_space<vmem>>) attributes {dimension_semantics = [#tpu.dimension_semantics<parallel>], iteration_bounds = array<i64: 8>, scalar_prefetch = 0 : i64, scratch_operands = 0 : i64, tpu.core_type = #tpu.core_type<tc>, window_params = [{transform_indices = @transform_0, window_bounds = array<i64: 16, 128>}, {transform_indices = @transform_1, window_bounds = array<i64: 16, 5>}, {transform_indices = @transform_2, window_bounds = array<i64: 16, 128>}]} {
    %c0 = arith.constant 0 : index
    %c0_0 = arith.constant 0 : index
    %0 = vector.load %arg1[%c0, %c0_0] : memref<16x128xf32, #tpu.memory_space<vmem>>, vector<16x128xf32>
    %c0_1 = arith.constant 0 : index
    %c0_2 = arith.constant 0 : index
    %1 = vector.load %arg2[%c0_1, %c0_2] : memref<16x5xf32, #tpu.memory_space<vmem>>, vector<16x1xf32>
    %c0_3 = arith.constant 0 : index
    %c1 = arith.constant 1 : index
    %2 = vector.load %arg2[%c0_3, %c1] : memref<16x5xf32, #tpu.memory_space<vmem>>, vector<16x1xf32>
    %c0_4 = arith.constant 0 : index
    %c2 = arith.constant 2 : index
    %3 = vector.load %arg2[%c0_4, %c2] : memref<16x5xf32, #tpu.memory_space<vmem>>, vector<16x1xf32>
    %c0_5 = arith.constant 0 : index
    %c3 = arith.constant 3 : index
    %4 = vector.load %arg2[%c0_5, %c3] : memref<16x5xf32, #tpu.memory_space<vmem>>, vector<16x1xf32>
    %c0_6 = arith.constant 0 : index
    %c4 = arith.constant 4 : index
    %5 = vector.load %arg2[%c0_6, %c4] : memref<16x5xf32, #tpu.memory_space<vmem>>, vector<16x1xf32>
    %6 = arith.mulf %3, %3 : vector<16x1xf32>
    %7 = arith.mulf %1, %6 : vector<16x1xf32>
    %8 = vector.broadcast %2 : vector<16x1xf32> to vector<16x128xf32>
    %9 = arith.subf %0, %8 : vector<16x128xf32>
    %10 = arith.mulf %9, %9 : vector<16x128xf32>
    %11 = vector.broadcast %6 : vector<16x1xf32> to vector<16x128xf32>
    %12 = arith.addf %10, %11 : vector<16x128xf32>
    %13 = vector.broadcast %4 : vector<16x1xf32> to vector<16x128xf32>
    %14 = arith.mulf %13, %0 : vector<16x128xf32>
    %15 = vector.broadcast %5 : vector<16x1xf32> to vector<16x128xf32>
    %16 = arith.addf %15, %14 : vector<16x128xf32>
    %17 = vector.broadcast %7 : vector<16x1xf32> to vector<16x128xf32>
    %18 = arith.divf %17, %12 : vector<16x128xf32>
    %19 = arith.addf %16, %18 : vector<16x128xf32>
    %c0_7 = arith.constant 0 : index
    %c0_8 = arith.constant 0 : index
    %20 = vector.load %arg3[%c0_7, %c0_8] : memref<16x128xf32, #tpu.memory_space<vmem>>, vector<16x128xf32>
    tpu.vector_store %arg3[%c0_7, %c0_8], %19 {strides = array<i32>} : memref<16x128xf32, #tpu.memory_space<vmem>>, vector<16x128xf32>,
    return
  }
  func.func @transform_0(%arg0: i32) -> (i32, i32) {
    %c0_i32 = arith.constant 0 : i32
    %c0_i32_0 = arith.constant 0 : i32
    return %arg0, %c0_i32 : i32, i32
  }
  func.func @transform_1(%arg0: i32) -> (i32, i32) {
    %c0_i32 = arith.constant 0 : i32
    %c0_i32_0 = arith.constant 0 : i32
    return %arg0, %c0_i32 : i32, i32
  }
  func.func @transform_2(%arg0: i32) -> (i32, i32) {
    %c0_i32 = arith.constant 0 : i32
    %c0_i32_0 = arith.constant 0 : i32
    return %arg0, %c0_i32 : i32, i32
  }
}

</mosaic_0001>

<bundles_post_ra>
// kernel: tpu_custom_call.1
= control target key start
LH: loop header
LB: loop body
LE: loop exit
PB: predicated region body
PF: predicated region fallthrough
CT: control target
= control target key end

     0   :  { %7 = vsyncpa [#allocation3], 0  ;;  %s604_s0 = inlined_call_operand.vmem [shape: f32[128,128], index: 0, kind: input, shape index: {}]   ;;  %s605_s1 = inlined_call_operand.vmem [shape: f32[128,5], index: 1, kind: input, shape index: {}]   ;;  %s606_s2 = inlined_call_operand.hbm [shape: f32[128,128], index: 2, kind: output, shape index: {}]  }
   0x1   :  { %9 = vsyncpa [#allocation3 + $0x1], 0  ;;  %s493_s9 = smov 0   ;;  %s495_s10 = smov 0  }
   0x2   :  { %s497_s11 = smov 0   ;;  %s499_s12 = smov 0  }
   0x3 LB: > { %s514_s13 = sadd.s32 4294967295, %s467_s12   ;;  %s333_s14 = sadd.s32 4294967294, %s467_s12   ;;  %s467_s12 = sphi %s499_s12, %s612_s12   ;;  %s463_s11 = sphi %s497_s11, %s611_s11   ;;  %s459_s10 = sphi %s495_s10, %s610_s10   ;;  %s455_s9 = sphi %s493_s9, %s609_s9  }
   0x4   : > { %s518_s15 = sadd.s32 1, %s467_s12   ;;  %s74_s16 = sadd.s32 1, %s463_s11 }
   0x5   : > { %s71_s17 = ssub.s32 %s467_s12, %s518_s15  ;;  %p84_p0 = scmp.ne.s32.totalorder %s463_s11, %s459_s10 }
   0x6   : > { %p72_p1 = scmp.eq.s32.totalorder %s71_s17, 0  ;;  %p85_p2 = scmp.eq.s32.totalorder %s514_s13, 7 }
   0x7   : > { %p90_p3 = scmp.ne.s32.totalorder %s459_s10, %s455_s9  ;;  %p91_p4 = scmp.eq.s32.totalorder %s333_s14, 7 }
   0x8   : > { %s529_s18 = scalar_select %p72_p1, %s463_s11, %s74_s16  }
   0x9   : > { %p531_p5 = por %p85_p2, %p84_p0  ;;  %p535_p6 = por %p91_p4, %p90_p3 }
   0xa   : > { %p336_p7 = scmp.ge.s32.totalorder %s467_s12, 1  ;;  %p127_p8 = scmp.lt.s32.totalorder %s467_s12, 9 }
   0xc   : > { %p128_p9 = pnand %p336_p7, %p127_p8 }
   0xd   : > { %s338_s21 = sshll.u32 (!%p128_p9), %s514_s13, 1  ;;  %s471_s26 = smov (!%p128_p9), 126  }
   0xe   : > { %131 = sbr.rel (%p128_p9) target bundleno = 288 (0x120), region = 28  ;;  %p155_p10 = scmp.lt.s32.totalorder (!%p128_p9), %s338_s21, 15 }
   0xf   : > { %s151_s30 = sand.u32 (!%p128_p9), 1, %s459_s10   ;;  %s347_s6 = sshll.u32 (!%p128_p9), %s514_s13, 8 }
  0x10   : > { %s337_s3 = sshll.u32 (!%p128_p9), %s151_s30, 4  ;;  %s562_s14 = scalar_lea.hbm (!%p128_p9), %s606_s2, %s347_s6 }
  0x11   : > { %s153_s4 = scalar_lea.vmem (!%p128_p9), [#allocation2], %s337_s3  ;;  %s564_s16 = scalar_lea.sflag (!%p128_p9), [#allocation3], %s151_s30 }
  0x12   : > { %s259_s5 = sshll.u32 (!%p128_p9), %s153_s4, 4  ;;  %s475_s17 = smov (!%p128_p9), [#allocation2]   ;;  %s557_s5 = int_to_ptr.vmem [resolvable:$true] %s259_s5 }
  0x13   : > { %v469_v0 = vmov 1   ;;  %v470_v1 = vmov 2   ;;  %s614_s21 = smov (!%p155_p10, %s338_s21), 15  ;;  %v472_v6 = vmov 3   ;;  %v473_v7 = vmov 4   ;;  %s407_s13 = scalar_lea.vmem %s557_s5, 256 }
  0x14   : > { %395 = vset.pattern.permute.xlu1 %v469_v0  ;;  %396 = vset.pattern.permute.xlu0 %v470_v1  ;;  %s339_s22 = sshll.u32 %s614_s21, 3  ;;  %v474_v8 = vmov 0   ;;  %p408_p11 = scmp.ne.s32.totalorder %s557_s5, %s407_s13 }
  0x15   : > { %s164_s25 = scalar_lea.vmem %s605_s1, %s339_s22  ;;  %s158_s29 = scalar_lea.vmem %s604_s0, %s339_s22 }
  0x16   : > { %v169_v2 = vld [vmem:[%s164_s25] sm:$0xff]  ;;  %v170_v3 = vld [vmem:[%s164_s25 + $0x8] sm:$0xff]  ;;  %p409_p12 = pnand %p408_p11, %p531_p5  ;;  %s411_s21 = sshll.u32 %s475_s17, 4  ;;  %s412_s21 = int_to_ptr.vmem [resolvable:$false] %s411_s21 }
  0x17   : > { %v171_v4 = vmul.f32 %v169_v2, %v169_v2  ;;  %185 = vperm.xlu1 %395, %v169_v2   ;;  %v172_v5 = vmul.f32 %v170_v3, %v170_v3  ;;  %v167_v14 = vld [vmem:[%s158_s29] sm:$0xff]  ;;  %v168_v17 = vld [vmem:[%s158_s29 + $0x8] sm:$0xff]  ;;  %s413_s22 = scalar_lea.vmem %s412_s21, 512  ;;  %p414_p0 = scmp.lt.s32.totalorder %s557_s5, %s412_s21 }
  0x18   : > { %p410_p13 = pneg %p409_p12  ;;  %p415_p1 = scmp.lt.s32.totalorder %s413_s22, %s407_s13 }
  0x19   : > { %175 = vrot.lane.b32.xlu0 %v171_v4, %s471_s26 }
  0x1a   : > { %p416_p2 = por %p415_p1, %p414_p0 }
  0x1b   : > { %190 = vperm.xlu1 %395, %v170_v3  }
  0x1c   : > { %p417_p3 = pnand %p416_p2, %p410_p13 }
  0x1d   : > { %177 = vrot.lane.b32.xlu0 %v172_v5, %s471_s26 }
  0x1f   : > { %397 = vset.pattern.permute.xlu1 %v470_v1 }
  0x20   : > { %202 = vperm.xlu1 %397, %v172_v5  }
  0x21   : > { %198 = vperm.xlu0 %396, %v171_v4  }
  0x24   : > { %398 = vset.pattern.permute.xlu1 %v472_v6 }
  0x25   : > { %208 = vperm.xlu1 %398, %v169_v2   ;;  %399 = vset.pattern.permute.xlu0 %v472_v6 }
  0x26   : > { %212 = vperm.xlu0 %399, %v170_v3  }
  0x29   : > { %400 = vset.pattern.permute.xlu1 %v473_v7 }
  0x2a   : > { %218 = vperm.xlu1 %400, %v169_v2   ;;  %401 = vset.pattern.permute.xlu0 %v474_v8 }
  0x2e   : > { %222 = vperm.xlu1 %400, %v170_v3  }
  0x32   : > { %402 = vset.pattern.permute.xlu1 %v474_v8 }
  0x8b   : > { %v176_v9 = vpop.permute.xlu0 %175 }
  0x8c   : > { %v181_v10 = vmul.f32 %v176_v9, %v169_v2 }
  0x8e   : > { %229 = vperm.xlu0 %401, %v181_v10  }
  0x8f   : > { %v178_v11 = vpop.permute.xlu0 %177 }
  0x90   : > { %v182_v12 = vmul.f32 %v178_v11, %v170_v3 }
  0x92   : > { %234 = vperm.xlu1 %402, %v182_v12   ;;  %v186_v13 = vpop.permute.xlu1 %185 }
  0x93   : > { %v193_v15 = vsub.f32 %v167_v14, %v186_v13 }
  0x95   : > { %v195_v18 = vmul.f32 %v193_v15, %v193_v15 }
  0x96   : > { %v191_v16 = vpop.permute.xlu1 %190 }
  0x97   : > { %v194_v19 = vsub.f32 %v168_v17, %v191_v16 }
  0x99   : > { %v196_v21 = vmul.f32 %v194_v19, %v194_v19 }
  0x9b   : > { %v203_v23 = vpop.permute.xlu1 %202 }
  0x9c   : > { %v199_v20 = vpop.permute.xlu0 %198  ;;  %v206_v24 = vadd.f32 %v203_v23, %v196_v21 }
  0x9d   : > { %v205_v22 = vadd.f32 %v199_v20, %v195_v18 }
  0x9f   : > { %403 = vrcp.f32 %v205_v22 }
  0xa0   : > { %v209_v25 = vpop.permute.xlu1 %208  ;;  %405 = vrcp.f32 %v206_v24 }
  0xa1   : > { %v213_v27 = vpop.permute.xlu0 %212  ;;  %v215_v28 = vmul.f32 %v209_v25, %v167_v14 }
  0xa2   : > { %v216_v33 = vmul.f32 %v213_v27, %v168_v17 }
  0xa5   : > { %v219_v26 = vpop.permute.xlu1 %218 }
  0xa6   : > { %v225_v32 = vadd.f32 %v219_v26, %v215_v28 }
  0xa9   : > { %v223_v30 = vpop.permute.xlu1 %222 }
  0xaa   : > { %v226_v38 = vadd.f32 %v223_v30, %v216_v33 }
  0xac   : > { %v404_v29 = vpop.eup %403 }
  0xad   : > { %v406_v36 = vpop.eup %405 }
 0x109   : > { %v230_v31 = vpop.permute.xlu0 %229 }
 0x10a   : > { %v238_v34 = vmul.f32 %v404_v29, %v230_v31 }
 0x10c   : > { %v241_v35 = vadd.f32 %v238_v34, %v225_v32 }
 0x10d   : > { %v235_v37 = vpop.permute.xlu1 %234 }
 0x10e   : > { %243 = vst [vmem:[%s153_s4] sm:$0xff] %v241_v35  ;;  %v240_v39 = vmul.f32 %v406_v36, %v235_v37 }
 0x110   : > { %v242_v40 = vadd.f32 %v240_v39, %v226_v38 }
 0x112   : > { %244 = vst [vmem:[%s153_s4 + $0x8] sm:$0xff] %v242_v40 }
 0x113   : > { %420 = shalt.err (!%p417_p3)
}
 0x114   : > { %s421_s23 = scalar_lea.hbm %s562_s14, 256  ;;  %s425_s26 = scalar_lea.hbm %s606_s2, 2048 }
 0x115   : > { %p422_p4 = scmp.ne.s32.totalorder %s562_s14, %s421_s23  ;;  %p426_p9 = scmp.lt.s32.totalorder %s562_s14, %s606_s2 }
 0x116   : > { %p427_p10 = scmp.lt.s32.totalorder %s425_s26, %s421_s23 }
 0x117   : > { %p423_p7 = pnand %p422_p4, %p531_p5 }
 0x118   : > { %p428_p11 = por %p427_p10, %p426_p9 }
 0x119   : > { %p424_p8 = pneg %p423_p7 }
 0x11b   : > { %p429_p12 = pnand %p428_p11, %p424_p8 }
 0x11d   : > { %432 = shalt.err (!%p429_p12)
}
 0x11e   : > { %s476_s29 = smov 128   ;;  %s477_s30 = smov 8  }
 0x11f   : > { %348 = dma.vmem_to_hbm [thread:$0]  (%p531_p5), %s557_s5, 256, %s562_s14, %s564_s16, %s476_s29, %s476_s29, %s477_s30  }
 0x120 PF: > { %p354_p13 = scmp.ge.s32.totalorder %s467_s12, 2  ;;  %s274_s3 = sand.u32 1, %s455_s9  }
 0x121   : > { %s275_s4 = scalar_lea.sflag [#allocation3], %s274_s3 }
 0x122   : > { %p351_p0 = pnand %p354_p13, %p535_p6 }
 0x124   : > { %p352_p1 = pneg %p351_p0 }
 0x126   : > { %450 = dma.done.wait (%p352_p1), %s275_s4, 256  }
 0x127   : > { %452 = vsyncadd (%p352_p1), %s275_s4, 4294967040  ;;  %p12_p2 = scmp.ge.s32.totalorder %s518_s15, 10   ;;  %s609_s9 = smov %s459_s10 }
 0x128   : > { %s610_s10 = smov %s463_s11  ;;  %s611_s11 = smov %s529_s18 }
 0x129   : > { %s612_s12 = smov %s518_s15  ;;  %14 = sbr.rel (!%p12_p2) target bundleno = 3 (0x3), region = 66 }
 0x12e   :  { %280 = vsyncpa [#allocation3], 1 }
 0x12f   :  { %282 = vsyncpa [#allocation3 + $0x1], 1 }

</bundles_post_ra>
